<compile_context>
chip_gen: v5e
topology: v5e:2x2
jax: 0.10.0
libtpu: 0.0.40
codegen_flags: <defaults>
</compile_context>

<pallas_src>
import jax
import jax.numpy as jnp
from jax.experimental import pallas as pl
from jax.experimental.pallas import tpu as pltpu


_LANE = 128
_SUBLANE = 8
_ROW_BLOCK_MAX = 256     # rows per grid step (multiple of 8)
_HW_TILE_MAX = 2048      # lanes per grid step (multiple of 128)


def _round_up(x, m):
    return (x + m - 1) // m * m


def _dice_partial_kernel(x_ref, t_ref, inter_ref, sumxt_ref):
    # x_ref, t_ref: (R_BLK, HW_TILE) tiles in VMEM (native dtype, cast here)
    # inter_ref, sumxt_ref: (R_BLK, 1) f32 accumulators, resident across the
    # HW (reduction) grid axis.
    j = pl.program_id(1)

    @pl.when(j == 0)
    def _():
        inter_ref[...] = jnp.zeros_like(inter_ref)
        sumxt_ref[...] = jnp.zeros_like(sumxt_ref)

    x = x_ref[...].astype(jnp.float32)
    t = t_ref[...].astype(jnp.float32)

    # sum(x) + sum(t) == sum(x + t): one accumulate stream instead of two.
    inter_ref[...] += jnp.sum(x * t, axis=1, keepdims=True)
    sumxt_ref[...] += jnp.sum(x + t, axis=1, keepdims=True)


def multiclass_dice_loss(inp, target, weights=None):
    """inp, target: (N, C, *spatial), any float/int dtype. Returns scalar f32 loss."""
    N, C = inp.shape[0], inp.shape[1]
    hw = 1
    for d in inp.shape[2:]:
        hw *= int(d)
    rows = N * C

    # Zero-copy reshape to (N*C, HW); keep native dtypes (kernel casts).
    x = inp.reshape(rows, hw)
    t = target.reshape(rows, hw)

    # Tile sizing: rows in multiples of 8 (sublanes), HW in multiples of 128 (lanes).
    r_blk = min(_ROW_BLOCK_MAX, _round_up(rows, _SUBLANE))
    rows_p = _round_up(rows, r_blk)
    if hw <= _HW_TILE_MAX:
        hw_tile = _round_up(hw, _LANE)
        hw_p = hw_tile
    else:
        hw_tile = _HW_TILE_MAX
        hw_p = _round_up(hw, hw_tile)

    # Zero padding is harmless for the sum-based partial reductions; padded rows
    # are sliced off before the dice formula.
    if rows_p != rows or hw_p != hw:
        pad = ((0, rows_p - rows), (0, hw_p - hw))
        x = jnp.pad(x, pad)
        t = jnp.pad(t, pad)

    grid = (rows_p // r_blk, hw_p // hw_tile)

    inter, sum_xt = pl.pallas_call(
        _dice_partial_kernel,
        out_shape=(jax.ShapeDtypeStruct((rows_p, 1), jnp.float32),
                   jax.ShapeDtypeStruct((rows_p, 1), jnp.float32)),
        grid=grid,
        in_specs=[
            pl.BlockSpec((r_blk, hw_tile), lambda i, j: (i, j)),
            pl.BlockSpec((r_blk, hw_tile), lambda i, j: (i, j)),
        ],
        out_specs=[
            pl.BlockSpec((r_blk, 1), lambda i, j: (i, 0)),
            pl.BlockSpec((r_blk, 1), lambda i, j: (i, 0)),
        ],
        compiler_params=pltpu.CompilerParams(
            dimension_semantics=("parallel", "arbitrary"),  # rows parallel (v7x), HW reduce
            vmem_limit_bytes=32 * 1024 * 1024,
        ),
    )(x, t)

    # Cheap tail on (N, C) scalars in plain JAX.
    smooth = jnp.float32(1e-4)
    inter = inter[:rows, 0].reshape(N, C)
    sum_xt = sum_xt[:rows, 0].reshape(N, C)

    dice = (2.0 * inter + smooth) / (sum_xt + smooth)           # (N, C)
    per_class = 1.0 - jnp.sum(dice, axis=0) / jnp.float32(N)    # (C,)
    if weights is not None:
        per_class = per_class * jnp.asarray(weights, jnp.float32)
    return jnp.sum(per_class)


def _reference_loss(inp, target, weights=None):
    """Plain-JAX reference reproducing the PyTorch forward exactly."""
    N, C = inp.shape[0], inp.shape[1]
    smooth = 1e-4
    total = jnp.float32(0.0)
    for i in range(C):
        xi = inp[:, i].reshape(N, -1).astype(jnp.float32)
        ti = target[:, i].reshape(N, -1).astype(jnp.float32)
        inter = jnp.sum(xi * ti, axis=1)
        dice = (2.0 * inter + smooth) / (jnp.sum(xi, axis=1) + jnp.sum(ti, axis=1) + smooth)
        loss = 1.0 - jnp.sum(dice) / N
        if weights is not None:
            loss = loss * weights[i]
        total = total + loss
    return total


if __name__ == "__main__":
    key = jax.random.PRNGKey(0)

    def make_case(k, N, C, H, W):
        k1, k2 = jax.random.split(k)
        logits = jax.random.normal(k1, (N, C, H, W), jnp.float32)
        probs = jax.nn.softmax(logits, axis=1)               # per-pixel class probs
        labels = jax.random.randint(k2, (N, H, W), 0, C)
        onehot = jnp.transpose(jax.nn.one_hot(labels, C, dtype=jnp.float32),
                               (0, 3, 1, 2))                  # (N, C, H, W)
        return probs, onehot

    k1, k2, k3 = jax.random.split(key, 3)

    # Case 1: lane-aligned spatial, no weights.
    inp1, tgt1 = make_case(k1, 2, 4, 16, 16)
    loss1 = jax.block_until_ready(multiclass_dice_loss(inp1, tgt1))
    ref1 = _reference_loss(inp1, tgt1)
    assert jnp.allclose(loss1, ref1, rtol=1e-5, atol=1e-5), (loss1, ref1)

    # Case 2: non-aligned spatial (exercises row/lane zero padding) + class weights.
    inp2, tgt2 = make_case(k2, 2, 3, 10, 13)
    w = jnp.array([0.5, 1.0, 2.0], jnp.float32)
    loss2 = jax.block_until_ready(multiclass_dice_loss(inp2, tgt2, w))
    ref2 = _reference_loss(inp2, tgt2, w)
    assert jnp.allclose(loss2, ref2, rtol=1e-5, atol=1e-5), (loss2, ref2)

    # Case 3: multiple HW tiles (exercises partial-sum accumulation across grid).
    inp3, tgt3 = make_case(k3, 2, 4, 64, 64)
    loss3 = jax.block_until_ready(multiclass_dice_loss(inp3, tgt3))
    ref3 = _reference_loss(inp3, tgt3)
    assert jnp.allclose(loss3, ref3, rtol=1e-5, atol=1e-5), (loss3, ref3)

    print("KERNEL_OK")
</pallas_src>

<mosaic_0001>
module attributes {stable_mosaic.version = 11 : i64} {
  func.func @_dice_partial_kernel(%arg0: i32, %arg1: i32, %arg2: memref<8x256xf32, #tpu.memory_space<vmem>>, %arg3: memref<8x256xf32, #tpu.memory_space<vmem>>, %arg4: memref<8x1xf32, #tpu.memory_space<vmem>>, %arg5: memref<8x1xf32, #tpu.memory_space<vmem>>) attributes {dimension_semantics = [#tpu.dimension_semantics<parallel>, #tpu.dimension_semantics<arbitrary>], iteration_bounds = array<i64: 1, 1>, scalar_prefetch = 0 : i64, scratch_operands = 0 : i64, tpu.core_type = #tpu.core_type<tc>, window_params = [{transform_indices = @transform_0, window_bounds = array<i64: 8, 256>}, {transform_indices = @transform_1, window_bounds = array<i64: 8, 256>}, {transform_indices = @transform_2, window_bounds = array<i64: 8, 1>}, {transform_indices = @transform_3, window_bounds = array<i64: 8, 1>}]} {
    %c0_i32 = arith.constant 0 : i32
    %0 = arith.cmpi eq, %arg1, %c0_i32 : i32
    %1 = arith.extui %0 : i1 to i32
    %c0_i32_0 = arith.constant 0 : i32
    %2 = arith.cmpi ne, %1, %c0_i32_0 : i32
    scf.if %2 {
      %cst_13 = arith.constant 0.000000e+00 : f32
      %17 = vector.broadcast %cst_13 : f32 to vector<8x1xf32>
      %c0_14 = arith.constant 0 : index
      %c0_15 = arith.constant 0 : index
      %18 = vector.load %arg4[%c0_14, %c0_15] : memref<8x1xf32, #tpu.memory_space<vmem>>, vector<8x1xf32>
      tpu.vector_store %arg4[%c0_14, %c0_15], %17 {strides = array<i32>} : memref<8x1xf32, #tpu.memory_space<vmem>>, vector<8x1xf32>,
      %cst_16 = arith.constant 0.000000e+00 : f32
      %19 = vector.broadcast %cst_16 : f32 to vector<8x1xf32>
      %c0_17 = arith.constant 0 : index
      %c0_18 = arith.constant 0 : index
      %20 = vector.load %arg5[%c0_17, %c0_18] : memref<8x1xf32, #tpu.memory_space<vmem>>, vector<8x1xf32>
      tpu.vector_store %arg5[%c0_17, %c0_18], %19 {strides = array<i32>} : memref<8x1xf32, #tpu.memory_space<vmem>>, vector<8x1xf32>,
    } else {
    }
    %c0 = arith.constant 0 : index
    %c0_1 = arith.constant 0 : index
    %3 = vector.load %arg2[%c0, %c0_1] : memref<8x256xf32, #tpu.memory_space<vmem>>, vector<8x256xf32>
    %c0_2 = arith.constant 0 : index
    %c0_3 = arith.constant 0 : index
    %4 = vector.load %arg3[%c0_2, %c0_3] : memref<8x256xf32, #tpu.memory_space<vmem>>, vector<8x256xf32>
    %c0_4 = arith.constant 0 : index
    %c0_5 = arith.constant 0 : index
    %5 = vector.load %arg4[%c0_4, %c0_5] : memref<8x1xf32, #tpu.memory_space<vmem>>, vector<8x1xf32>
    %6 = arith.mulf %3, %4 : vector<8x256xf32>
    %cst = arith.constant dense<0.000000e+00> : vector<8xf32>
    %7 = vector.multi_reduction <add>, %6, %cst [1] : vector<8x256xf32> to vector<8xf32>
    %8 = vector.shape_cast %7 : vector<8xf32> to vector<8x1xf32>
    %9 = arith.addf %5, %8 : vector<8x1xf32>
    %c0_6 = arith.constant 0 : index
    %c0_7 = arith.constant 0 : index
    %10 = vector.load %arg4[%c0_6, %c0_7] : memref<8x1xf32, #tpu.memory_space<vmem>>, vector<8x1xf32>
    tpu.vector_store %arg4[%c0_6, %c0_7], %9 {strides = array<i32>} : memref<8x1xf32, #tpu.memory_space<vmem>>, vector<8x1xf32>,
    %c0_8 = arith.constant 0 : index
    %c0_9 = arith.constant 0 : index
    %11 = vector.load %arg5[%c0_8, %c0_9] : memref<8x1xf32, #tpu.memory_space<vmem>>, vector<8x1xf32>
    %12 = arith.addf %3, %4 : vector<8x256xf32>
    %cst_10 = arith.constant dense<0.000000e+00> : vector<8xf32>
    %13 = vector.multi_reduction <add>, %12, %cst_10 [1] : vector<8x256xf32> to vector<8xf32>
    %14 = vector.shape_cast %13 : vector<8xf32> to vector<8x1xf32>
    %15 = arith.addf %11, %14 : vector<8x1xf32>
    %c0_11 = arith.constant 0 : index
    %c0_12 = arith.constant 0 : index
    %16 = vector.load %arg5[%c0_11, %c0_12] : memref<8x1xf32, #tpu.memory_space<vmem>>, vector<8x1xf32>
    tpu.vector_store %arg5[%c0_11, %c0_12], %15 {strides = array<i32>} : memref<8x1xf32, #tpu.memory_space<vmem>>, vector<8x1xf32>,
    return
  }
  func.func @transform_0(%arg0: i32, %arg1: i32) -> (i32, i32) {
    %c0_i32 = arith.constant 0 : i32
    return %arg0, %arg1 : i32, i32
  }
  func.func @transform_1(%arg0: i32, %arg1: i32) -> (i32, i32) {
    %c0_i32 = arith.constant 0 : i32
    return %arg0, %arg1 : i32, i32
  }
  func.func @transform_2(%arg0: i32, %arg1: i32) -> (i32, i32) {
    %c0_i32 = arith.constant 0 : i32
    %c0_i32_0 = arith.constant 0 : i32
    return %arg0, %c0_i32 : i32, i32
  }
  func.func @transform_3(%arg0: i32, %arg1: i32) -> (i32, i32) {
    %c0_i32 = arith.constant 0 : i32
    %c0_i32_0 = arith.constant 0 : i32
    return %arg0, %c0_i32 : i32, i32
  }
}

</mosaic_0001>

<bundles_post_ra>
// kernel: tpu_custom_call.1
= control target key start
LH: loop header
LB: loop body
LE: loop exit
PB: predicated region body
PF: predicated region fallthrough
CT: control target
= control target key end

     0   :  { %9 = vsyncpa [#allocation3], 0  ;;  %s185_s0 = inlined_call_operand.hbm [shape: f32[8,256], index: 0, kind: input, shape index: {}]   ;;  %s186_s1 = inlined_call_operand.hbm [shape: f32[8,256], index: 1, kind: input, shape index: {}]   ;;  %s187_s2 = inlined_call_operand.vmem [shape: f32[8,1], index: 2, kind: output, shape index: {0}]   ;;  %s188_s3 = inlined_call_operand.vmem [shape: f32[8,1], index: 3, kind: output, shape index: {1}]  }
   0x1   :  { %s16_s14 = sshll.u32 %s185_s0, 4  ;;  %s17_s14 = int_to_ptr.hbm [resolvable:$true] %s16_s14 }
   0x2   :  { %10 = vsyncpa [#allocation5], 0  ;;  %s134_s15 = smov [#allocation2]   ;;  %s27_s19 = sshll.u32 %s186_s1, 4  ;;  %s28_s19 = int_to_ptr.hbm [resolvable:$true] %s27_s19 }
   0x3   :  { %s18_s16 = sshll.u32 %s134_s15, 4  ;;  %s135_s20 = smov [#allocation4]   ;;  %s19_s16 = int_to_ptr.vmem [resolvable:$true] %s18_s16 }
   0x4   :  { %21 = dma.hbm_to_vmem [thread:$0]  %s17_s14, 256, %s19_s16, [#allocation3]  }
   0x5   :  { %s29_s21 = sshll.u32 %s135_s20, 4  ;;  %s30_s21 = int_to_ptr.vmem [resolvable:$true] %s29_s21 }
   0x6   :  { %32 = dma.hbm_to_vmem [thread:$0]  %s28_s19, 256, %s30_s21, [#allocation5]  }
   0x7   :  { %130 = dma.done.wait [#allocation3], 256  }
   0x8   :  { %131 = vsyncadd [#allocation3], 4294967040 }
   0x9   :  { %132 = dma.done.wait [#allocation5], 256  }
   0xa   :  { %133 = vsyncadd [#allocation5], 4294967040  ;;  %vm45_vm0 = vcmask 7168   ;;  %v136_v0 = vmov 0.0   ;;  %v48_v1 = vld [vmem:[#allocation2] sm:$0xff]  ;;  %v49_v2 = vld [vmem:[#allocation2 + $0x8] sm:$0xff] }
   0xb   :  { %46 = vst.msk [vmem:[%s187_s2] sm:$0xff] %vm45_vm0, %v136_v0  ;;  %v50_v3 = vld [vmem:[#allocation4] sm:$0xff]  ;;  %v51_v4 = vld [vmem:[#allocation4 + $0x8] sm:$0xff] }
   0xc   :  { %47 = vst.msk [vmem:[%s188_s3] sm:$0xff] %vm45_vm0, %v136_v0  ;;  %v53_v5 = vmul.f32 %v50_v3, %v48_v1  ;;  %v54_v6 = vmul.f32 %v51_v4, %v49_v2  ;;  %v62_v8 = vadd.f32 %v50_v3, %v48_v1  ;;  %v63_v9 = vadd.f32 %v51_v4, %v49_v2 }
   0xe   :  { %v55_v7 = vadd.f32 %v54_v6, %v53_v5  ;;  %v64_v10 = vadd.f32 %v63_v9, %v62_v8 }
  0x10   :  { %56 = vadd.xlane.f32.xlu0 %v55_v7 }
  0x12   :  { %v52_v11 = vld [vmem:[%s187_s2] sm:$0xff] }
  0x13   :  { %v61_v14 = vld [vmem:[%s188_s3] sm:$0xff] }
  0x18   :  { %65 = vadd.xlane.f32.xlu0 %v64_v10 }
  0x83   :  { %v57_v12 = vpop.xlane.xlu0 %56 }
  0x84   :  { %v58_v13 = vadd.f32 %v57_v12, %v52_v11 }
  0x86   :  { %60 = vst.msk [vmem:[%s187_s2] sm:$0xff] %vm45_vm0, %v58_v13 }
  0x8b   :  { %v66_v15 = vpop.xlane.xlu0 %65 }
  0x8c   :  { %v67_v16 = vadd.f32 %v66_v15, %v61_v14 }
  0x8e   :  { %68 = vst.msk [vmem:[%s188_s3] sm:$0xff] %vm45_vm0, %v67_v16 }
  0x8f   :  { %77 = vsyncpa [#allocation3], 1 }
  0x90   :  { %78 = vsyncpa [#allocation5], 1 }

</bundles_post_ra>
